<compile_context>
chip_gen: v7x
topology: tpu7x:2x2x1
jax: 0.10.0
libtpu: 0.0.40
codegen_flags: <defaults>
</compile_context>

<pallas_src>
import functools

import jax
import jax.numpy as jnp
from jax.experimental import pallas as pl
from jax.experimental.pallas import tpu as pltpu

LEAKY_SLOPE = 0.01   # nn.LeakyReLU default
BN_EPS = 1e-5        # nn.BatchNorm1d default

N_USERS = 15400
N_ITEMS = 1000


def _round_up(x, m):
    return (x + m - 1) // m * m


def _make_kernel(n_hidden: int):
    """Ref order:
       u_feat, i_feat,
       w0_user, w0_item, b0,
       [w_k, b_k] for k in 1..n_hidden-1,
       w_out_row, b_out,
       out
    """

    def kernel(u_ref, it_ref, *rest):
        params = rest[:-1]
        out_ref = rest[-1]

        # ---- layer 0: split first-layer weight -> no in-kernel concat ----
        w0u, w0i, b0 = params[0], params[1], params[2]
        h = (jnp.dot(u_ref[...].astype(jnp.bfloat16), w0u[...],
                     preferred_element_type=jnp.float32)
             + jnp.dot(it_ref[...].astype(jnp.bfloat16), w0i[...],
                       preferred_element_type=jnp.float32)
             + b0[...])
        h = jnp.where(h > 0, h, LEAKY_SLOPE * h)
        # Dropout: identity in eval mode

        # ---- remaining hidden layers: (Linear + BN(eval)) folded -> dot + bias ----
        p = 3
        for _ in range(n_hidden - 1):
            w, b = params[p], params[p + 1]
            p += 2
            h = jnp.dot(h.astype(jnp.bfloat16), w[...],
                        preferred_element_type=jnp.float32) + b[...]
            h = jnp.where(h > 0, h, LEAKY_SLOPE * h)

        # ---- head: 1-column "matmul" on VPU (mul) + XLU (lane reduce) ----
        w_out_row, b_out = params[p], params[p + 1]
        z = jnp.sum(h * w_out_row[...], axis=-1)            # (tile_b,)
        # lane-dense (1, tile_b) store: one sublane->lane relayout instead of
        # tile_b masked 1-lane stores.
        out_ref[...] = jax.nn.sigmoid(z[None, :] + b_out[...])

    return kernel


@functools.partial(jax.jit, static_argnames=("n_hidden", "tile_b"))
def _run_fused(u_feat, i_feat, flat_params, *, n_hidden, tile_b):
    b_pad, user_dim = u_feat.shape
    item_dim = i_feat.shape[1]
    grid = (b_pad // tile_b,)

    const2d = lambda i: (0, 0)                 # weights stay VMEM-resident across tiles
    in_specs = [pl.BlockSpec((tile_b, user_dim), lambda i: (i, 0)),
                pl.BlockSpec((tile_b, item_dim), lambda i: (i, 0))]
    in_specs += [pl.BlockSpec(p.shape, const2d) for p in flat_params]
    out_spec = pl.BlockSpec((1, tile_b), lambda i: (0, i))   # lane-dense output blocks

    kernel = _make_kernel(n_hidden)
    return pl.pallas_call(
        kernel,
        out_shape=jax.ShapeDtypeStruct((1, b_pad), jnp.float32),
        grid_spec=pltpu.PrefetchScalarGridSpec(
            num_scalar_prefetch=0,
            grid=grid,
            in_specs=in_specs,
            out_specs=out_spec,
        ),
        compiler_params=pltpu.CompilerParams(
            dimension_semantics=("parallel",),   # v7x: shard batch tiles over 2 TCs
        ),
    )(u_feat, i_feat, *flat_params)


def init_params(key, user_embed_dim, item_embed_dim, hidden_layers_dim):
    """Synthetic parameters matching the PyTorch module's shapes.
    BN(eval) stats are randomized so the host-side fold is actually exercised."""
    params = {}
    keys = iter(jax.random.split(key, 8 * (len(hidden_layers_dim) + 2)))
    params["user_emb"] = jax.random.normal(next(keys), (N_USERS, user_embed_dim), jnp.float32)
    params["item_emb"] = jax.random.normal(next(keys), (N_ITEMS, item_embed_dim), jnp.float32)

    dims = [user_embed_dim + item_embed_dim] + list(hidden_layers_dim)
    raw, folded = [], []
    for i in range(len(hidden_layers_dim)):
        fan_in, fan_out = dims[i], dims[i + 1]
        bound = 1.0 / float(fan_in) ** 0.5
        w = jax.random.uniform(next(keys), (fan_in, fan_out), jnp.float32, -bound, bound)
        b = jax.random.uniform(next(keys), (1, fan_out), jnp.float32, -bound, bound)
        gamma = jax.random.uniform(next(keys), (1, fan_out), jnp.float32, 0.5, 1.5)
        beta = 0.1 * jax.random.normal(next(keys), (1, fan_out), jnp.float32)
        mean = 0.1 * jax.random.normal(next(keys), (1, fan_out), jnp.float32)
        var = jax.random.uniform(next(keys), (1, fan_out), jnp.float32, 0.5, 1.5)
        raw.append((w, b, gamma, beta, mean, var))
        # Fold BN(eval) into the linear layer:
        #   y = (x@w + b - mean)/sqrt(var+eps)*gamma + beta = x@(w*s) + (b*s + t)
        s = gamma / jnp.sqrt(var + BN_EPS)
        t = beta - mean * s
        folded.append(((w * s).astype(jnp.bfloat16),            # MXU operand
                       (b * s + t).astype(jnp.float32)))        # f32 epilogue bias
    fan_in = dims[-1]
    bound = 1.0 / float(fan_in) ** 0.5
    w_out = jax.random.uniform(next(keys), (fan_in, 1), jnp.float32, -bound, bound)
    b_out = jax.random.uniform(next(keys), (1, 1), jnp.float32, -bound, bound)
    params["layers_raw"] = raw
    params["layers_folded"] = folded
    params["w_out"] = w_out
    params["w_out_row"] = w_out.T          # (1, fan_in): head as VPU mul + lane reduce
    params["b_out"] = b_out
    return params


def feed_forward_network(x, params):
    """x: int32 (B, 2) with x[:,0]=user index, x[:,1]=item index. Returns (B, 1) f32."""
    B = x.shape[0]
    user_emb = params["user_emb"]
    item_emb = params["item_emb"]
    du = user_emb.shape[1]

    # Vectorized embedding gather (XLA gather) with clamped indices.
    uidx = jnp.clip(x[:, 0].astype(jnp.int32), 0, N_USERS - 1)
    iidx = jnp.clip(x[:, 1].astype(jnp.int32), 0, N_ITEMS - 1)
    u_feat = jnp.take(user_emb, uidx, axis=0)   # (B, du) f32
    i_feat = jnp.take(item_emb, iidx, axis=0)   # (B, di) f32

    # Tile selection: single tile for small batches; >=2 lane-dense-friendly
    # (128-multiple) tiles for large batches so v7x uses both TensorCores.
    if B <= 512:
        tile_b = _round_up(B, 8)
    else:
        tile_b = min(512, _round_up(pl.cdiv(B, 2), 128))
    b_pad = _round_up(B, tile_b)
    pad = b_pad - B
    if pad:
        u_feat = jnp.pad(u_feat, ((0, pad), (0, 0)))
        i_feat = jnp.pad(i_feat, ((0, pad), (0, 0)))

    # Flatten (BN-folded) parameters; split W0 into user/item halves -> no concat.
    w0, b0 = params["layers_folded"][0]
    flat = [w0[:du], w0[du:], b0]
    for (w, b) in params["layers_folded"][1:]:
        flat.extend([w, b])
    flat.extend([params["w_out_row"], params["b_out"]])

    out = _run_fused(u_feat, i_feat, tuple(flat),
                     n_hidden=len(params["layers_folded"]), tile_b=tile_b)
    return out[0, :B][:, None]   # (B, 1); padded columns dropped


def _reference(x, params):
    """Pure-JAX reference (unfolded BN, f32 everywhere) for correctness check."""
    user_e = jnp.take(params["user_emb"], x[:, 0], axis=0)
    item_e = jnp.take(params["item_emb"], x[:, 1], axis=0)
    h = jnp.concatenate([user_e, item_e], axis=1)
    for (w, b, gamma, beta, mean, var) in params["layers_raw"]:
        h = h @ w + b
        h = (h - mean) / jnp.sqrt(var + BN_EPS) * gamma + beta
        h = jnp.where(h > 0, h, LEAKY_SLOPE * h)
    logits = h @ params["w_out"] + params["b_out"]
    return jax.nn.sigmoid(logits)


if __name__ == "__main__":
    user_embed_dim = 16
    item_embed_dim = 16
    hidden_layers_dim = [32, 32]
    dropout_rate = 0.2  # inactive at inference
    batch = 8

    key = jax.random.PRNGKey(0)
    pkey, ukey, ikey = jax.random.split(key, 3)
    params = init_params(pkey, user_embed_dim, item_embed_dim, hidden_layers_dim)

    user_ids = jax.random.randint(ukey, (batch,), 0, N_USERS, dtype=jnp.int32)
    item_ids = jax.random.randint(ikey, (batch,), 0, N_ITEMS, dtype=jnp.int32)
    x = jnp.stack([user_ids, item_ids], axis=1)  # (B, 2) int32

    out = jax.block_until_ready(feed_forward_network(x, params))
    ref = _reference(x, params)

    assert out.shape == (batch, 1), out.shape
    # bf16 matmul operands (folded BN scales) loosen the tolerance vs the f32 reference
    assert jnp.allclose(out, ref, atol=2e-2), (out, ref)
    print("KERNEL_OK")
</pallas_src>

<mosaic_0001>
module attributes {stable_mosaic.version = 11 : i64} {
  func.func @kernel(%arg0: i32, %arg1: memref<8x16xf32, #tpu.memory_space<vmem>>, %arg2: memref<8x16xf32, #tpu.memory_space<vmem>>, %arg3: memref<16x32xbf16, #tpu.memory_space<vmem>>, %arg4: memref<16x32xbf16, #tpu.memory_space<vmem>>, %arg5: memref<1x32xf32, #tpu.memory_space<vmem>>, %arg6: memref<32x32xbf16, #tpu.memory_space<vmem>>, %arg7: memref<1x32xf32, #tpu.memory_space<vmem>>, %arg8: memref<1x32xf32, #tpu.memory_space<vmem>>, %arg9: memref<1x1xf32, #tpu.memory_space<vmem>>, %arg10: memref<1x8xf32, #tpu.memory_space<vmem>>) attributes {dimension_semantics = [#tpu.dimension_semantics<parallel>], iteration_bounds = array<i64: 1>, scalar_prefetch = 0 : i64, scratch_operands = 0 : i64, tpu.core_type = #tpu.core_type<tc>, window_params = [{transform_indices = @transform_0, window_bounds = array<i64: 8, 16>}, {transform_indices = @transform_1, window_bounds = array<i64: 8, 16>}, {pipeline_mode = #tpu.pipeline_mode<synchronous>, transform_indices = @transform_2, window_bounds = array<i64: 16, 32>}, {pipeline_mode = #tpu.pipeline_mode<synchronous>, transform_indices = @transform_3, window_bounds = array<i64: 16, 32>}, {pipeline_mode = #tpu.pipeline_mode<synchronous>, transform_indices = @transform_4, window_bounds = array<i64: 1, 32>}, {pipeline_mode = #tpu.pipeline_mode<synchronous>, transform_indices = @transform_5, window_bounds = array<i64: 32, 32>}, {pipeline_mode = #tpu.pipeline_mode<synchronous>, transform_indices = @transform_6, window_bounds = array<i64: 1, 32>}, {pipeline_mode = #tpu.pipeline_mode<synchronous>, transform_indices = @transform_7, window_bounds = array<i64: 1, 32>}, {pipeline_mode = #tpu.pipeline_mode<synchronous>, transform_indices = @transform_8, window_bounds = array<i64: 1, 1>}, {transform_indices = @transform_9, window_bounds = array<i64: 1, 8>}]} {
    %c0 = arith.constant 0 : index
    %c0_0 = arith.constant 0 : index
    %0 = vector.load %arg1[%c0, %c0_0] : memref<8x16xf32, #tpu.memory_space<vmem>>, vector<8x16xf32>
    %1 = arith.truncf %0 : vector<8x16xf32> to vector<8x16xbf16>
    %c0_1 = arith.constant 0 : index
    %c0_2 = arith.constant 0 : index
    %2 = vector.load %arg3[%c0_1, %c0_2] : memref<16x32xbf16, #tpu.memory_space<vmem>>, vector<16x32xbf16>
    %cst = arith.constant dense<0.000000e+00> : vector<8x32xf32>
    %3 = tpu.matmul %1, %2, %cst {dimension_numbers = #tpu.dot_dimension_numbers<[1], [0], [0], [1], [0, 0, 1, 1], [], []>} : vector<8x16xbf16>, vector<16x32xbf16>, vector<8x32xf32> -> vector<8x32xf32>
    %c0_3 = arith.constant 0 : index
    %c0_4 = arith.constant 0 : index
    %4 = vector.load %arg2[%c0_3, %c0_4] : memref<8x16xf32, #tpu.memory_space<vmem>>, vector<8x16xf32>
    %5 = arith.truncf %4 : vector<8x16xf32> to vector<8x16xbf16>
    %c0_5 = arith.constant 0 : index
    %c0_6 = arith.constant 0 : index
    %6 = vector.load %arg4[%c0_5, %c0_6] : memref<16x32xbf16, #tpu.memory_space<vmem>>, vector<16x32xbf16>
    %cst_7 = arith.constant dense<0.000000e+00> : vector<8x32xf32>
    %7 = tpu.matmul %5, %6, %cst_7 {dimension_numbers = #tpu.dot_dimension_numbers<[1], [0], [0], [1], [0, 0, 1, 1], [], []>} : vector<8x16xbf16>, vector<16x32xbf16>, vector<8x32xf32> -> vector<8x32xf32>
    %8 = arith.addf %3, %7 : vector<8x32xf32>
    %c0_8 = arith.constant 0 : index
    %c0_9 = arith.constant 0 : index
    %9 = vector.load %arg5[%c0_8, %c0_9] : memref<1x32xf32, #tpu.memory_space<vmem>>, vector<1x32xf32>
    %10 = vector.broadcast %9 : vector<1x32xf32> to vector<8x32xf32>
    %11 = arith.addf %8, %10 : vector<8x32xf32>
    %cst_10 = arith.constant 0.000000e+00 : f32
    %12 = vector.broadcast %cst_10 : f32 to vector<8x32xf32>
    %13 = arith.cmpf ogt, %11, %12 : vector<8x32xf32>
    %cst_11 = arith.constant 0.00999999977 : f32
    %14 = vector.broadcast %cst_11 : f32 to vector<8x32xf32>
    %15 = arith.mulf %14, %11 : vector<8x32xf32>
    %16 = arith.select %13, %11, %15 : vector<8x32xi1>, vector<8x32xf32>
    %17 = arith.truncf %16 : vector<8x32xf32> to vector<8x32xbf16>
    %c0_12 = arith.constant 0 : index
    %c0_13 = arith.constant 0 : index
    %18 = vector.load %arg6[%c0_12, %c0_13] : memref<32x32xbf16, #tpu.memory_space<vmem>>, vector<32x32xbf16>
    %cst_14 = arith.constant dense<0.000000e+00> : vector<8x32xf32>
    %19 = tpu.matmul %17, %18, %cst_14 {dimension_numbers = #tpu.dot_dimension_numbers<[1], [0], [0], [1], [0, 0, 1, 1], [], []>} : vector<8x32xbf16>, vector<32x32xbf16>, vector<8x32xf32> -> vector<8x32xf32>
    %c0_15 = arith.constant 0 : index
    %c0_16 = arith.constant 0 : index
    %20 = vector.load %arg7[%c0_15, %c0_16] : memref<1x32xf32, #tpu.memory_space<vmem>>, vector<1x32xf32>
    %21 = vector.broadcast %20 : vector<1x32xf32> to vector<8x32xf32>
    %22 = arith.addf %19, %21 : vector<8x32xf32>
    %cst_17 = arith.constant 0.000000e+00 : f32
    %23 = vector.broadcast %cst_17 : f32 to vector<8x32xf32>
    %24 = arith.cmpf ogt, %22, %23 : vector<8x32xf32>
    %cst_18 = arith.constant 0.00999999977 : f32
    %25 = vector.broadcast %cst_18 : f32 to vector<8x32xf32>
    %26 = arith.mulf %25, %22 : vector<8x32xf32>
    %27 = arith.select %24, %22, %26 : vector<8x32xi1>, vector<8x32xf32>
    %c0_19 = arith.constant 0 : index
    %c0_20 = arith.constant 0 : index
    %28 = vector.load %arg8[%c0_19, %c0_20] : memref<1x32xf32, #tpu.memory_space<vmem>>, vector<1x32xf32>
    %29 = vector.broadcast %28 : vector<1x32xf32> to vector<8x32xf32>
    %30 = arith.mulf %27, %29 : vector<8x32xf32>
    %cst_21 = arith.constant dense<0.000000e+00> : vector<8xf32>
    %31 = vector.multi_reduction <add>, %30, %cst_21 [1] : vector<8x32xf32> to vector<8xf32>
    %32 = vector.shape_cast %31 : vector<8xf32> to vector<1x8xf32>
    %c0_22 = arith.constant 0 : index
    %c0_23 = arith.constant 0 : index
    %33 = vector.load %arg9[%c0_22, %c0_23] : memref<1x1xf32, #tpu.memory_space<vmem>>, vector<1x1xf32>
    %34 = vector.broadcast %33 : vector<1x1xf32> to vector<1x8xf32>
    %35 = arith.addf %32, %34 : vector<1x8xf32>
    %36 = arith.negf %35 : vector<1x8xf32>
    %37 = math.exp %36 : vector<1x8xf32>
    %cst_24 = arith.constant 1.000000e+00 : f32
    %38 = vector.broadcast %cst_24 : f32 to vector<1x8xf32>
    %39 = arith.addf %38, %37 : vector<1x8xf32>
    %40 = arith.divf %38, %39 : vector<1x8xf32>
    %c0_25 = arith.constant 0 : index
    %c0_26 = arith.constant 0 : index
    %41 = vector.load %arg10[%c0_25, %c0_26] : memref<1x8xf32, #tpu.memory_space<vmem>>, vector<1x8xf32>
    tpu.vector_store %arg10[%c0_25, %c0_26], %40 {strides = array<i32>} : memref<1x8xf32, #tpu.memory_space<vmem>>, vector<1x8xf32>,
    return
  }
  func.func @transform_0(%arg0: i32) -> (i32, i32) {
    %c0_i32 = arith.constant 0 : i32
    %c0_i32_0 = arith.constant 0 : i32
    return %arg0, %c0_i32 : i32, i32
  }
  func.func @transform_1(%arg0: i32) -> (i32, i32) {
    %c0_i32 = arith.constant 0 : i32
    %c0_i32_0 = arith.constant 0 : i32
    return %arg0, %c0_i32 : i32, i32
  }
  func.func @transform_2(%arg0: i32) -> (i32, i32) {
    %c0_i32 = arith.constant 0 : i32
    %c0_i32_0 = arith.constant 0 : i32
    %c0_i32_1 = arith.constant 0 : i32
    return %c0_i32, %c0_i32_0 : i32, i32
  }
  func.func @transform_3(%arg0: i32) -> (i32, i32) {
    %c0_i32 = arith.constant 0 : i32
    %c0_i32_0 = arith.constant 0 : i32
    %c0_i32_1 = arith.constant 0 : i32
    return %c0_i32, %c0_i32_0 : i32, i32
  }
  func.func @transform_4(%arg0: i32) -> (i32, i32) {
    %c0_i32 = arith.constant 0 : i32
    %c0_i32_0 = arith.constant 0 : i32
    %c0_i32_1 = arith.constant 0 : i32
    return %c0_i32, %c0_i32_0 : i32, i32
  }
  func.func @transform_5(%arg0: i32) -> (i32, i32) {
    %c0_i32 = arith.constant 0 : i32
    %c0_i32_0 = arith.constant 0 : i32
    %c0_i32_1 = arith.constant 0 : i32
    return %c0_i32, %c0_i32_0 : i32, i32
  }
  func.func @transform_6(%arg0: i32) -> (i32, i32) {
    %c0_i32 = arith.constant 0 : i32
    %c0_i32_0 = arith.constant 0 : i32
    %c0_i32_1 = arith.constant 0 : i32
    return %c0_i32, %c0_i32_0 : i32, i32
  }
  func.func @transform_7(%arg0: i32) -> (i32, i32) {
    %c0_i32 = arith.constant 0 : i32
    %c0_i32_0 = arith.constant 0 : i32
    %c0_i32_1 = arith.constant 0 : i32
    return %c0_i32, %c0_i32_0 : i32, i32
  }
  func.func @transform_8(%arg0: i32) -> (i32, i32) {
    %c0_i32 = arith.constant 0 : i32
    %c0_i32_0 = arith.constant 0 : i32
    %c0_i32_1 = arith.constant 0 : i32
    return %c0_i32, %c0_i32_0 : i32, i32
  }
  func.func @transform_9(%arg0: i32) -> (i32, i32) {
    %c0_i32 = arith.constant 0 : i32
    %c0_i32_0 = arith.constant 0 : i32
    return %c0_i32, %arg0 : i32, i32
  }
}

</mosaic_0001>

<bundles_post_ra>
// kernel: _run_fused.1
= control target key start
LH: loop header
LB: loop body
LE: loop exit
PB: predicated region body
PF: predicated region fallthrough
CT: control target
= control target key end

     0   :  { %s646_s0 = inlined_call_operand.hbm [shape: f32[8,16], index: 0, kind: input, shape index: {}]   ;;  %s647_s1 = inlined_call_operand.hbm [shape: f32[8,16], index: 1, kind: input, shape index: {}]   ;;  %s648_s2 = inlined_call_operand.hbm [shape: bf16[16,32], index: 2, kind: input, shape index: {}]   ;;  %s649_s3 = inlined_call_operand.hbm [shape: bf16[16,32], index: 3, kind: input, shape index: {}]   ;;  %s650_s4 = inlined_call_operand.vmem [shape: f32[1,32], index: 4, kind: input, shape index: {}]   ;;  %s651_s5 = inlined_call_operand.vmem [shape: bf16[32,32], index: 5, kind: input, shape index: {}]   ;;  %s652_s6 = inlined_call_operand.vmem [shape: f32[1,32], index: 6, kind: input, shape index: {}]   ;;  %s653_s7 = inlined_call_operand.vmem [shape: f32[1,32], index: 7, kind: input, shape index: {}]   ;;  %s654_s8 = inlined_call_operand.<no memory space> [shape: f32[1,1], index: 8, kind: input, shape index: {}]   ;;  %s655_s9 = inlined_call_operand.hbm [shape: f32[1,8], index: 9, kind: output, shape index: {}]  }
   0x1   :  { %v14_v0 = vstv %s654_s8 }
   0x2   :  { %15 = vst [vmem:[#allocation2] sm:$0x1] %v14_v0 }
   0x3   :  { %16 = vsyncpa [#allocation4], 0 }
   0x4   :  { %17 = vsyncpa [#allocation7], 0 }
   0x5   :  { %18 = vsyncpa [#allocation10], 0 }
   0x6   :  { %19 = vsyncpa [#allocation5], 0  ;;  %s506_s11 = smov [#allocation6]   ;;  %s507_s13 = smov [#allocation3]  }
   0x7   :  { %s36_s12 = sshll.u32 %s506_s11, 4  ;;  %s26_s14 = sshll.u32 %s507_s13, 4  ;;  %s37_s12 = int_to_ptr.vmem [resolvable:$true] %s36_s12  ;;  %s27_s14 = int_to_ptr.vmem [resolvable:$true] %s26_s14 }
   0x8   :  { %s388_s17 = scalar_lea.hbm %s647_s1, 128 }
   0x9   :  { %p389_p0 = scmp.ne.s32.totalorder %s647_s1, %s388_s17  ;;  %p392_p1 = scmp.lt.u32.totalorder %s388_s17, %s647_s1 }
   0xb   :  { %p394_p2 = pnand %p392_p1, %p389_p0 }
   0xd   :  { %397 = shalt.err (!%p394_p2)
}
   0xe   :  { %s398_s21 = scalar_lea.vmem %s37_s12, 128  ;;  %p403_p4 = scmp.lt.s32.totalorder %s37_s12, %s37_s12 }
   0xf   :  { %p399_p3 = scmp.ne.s32.totalorder %s37_s12, %s398_s21  ;;  %p404_p5 = scmp.lt.s32.totalorder %s398_s21, %s398_s21 }
  0x11   :  { %p405_p6 = por %p404_p5, %p403_p4 }
  0x13   :  { %p406_p7 = pnand %p405_p6, %p399_p3 }
  0x15   :  { %409 = shalt.err (!%p406_p7)
}
  0x16   :  { %39 = dma.hbm_to_vmem [thread:$0]  %s647_s1, 128, %s37_s12, [#allocation7]  }
  0x17   :  { %s410_s26 = scalar_lea.hbm %s646_s0, 128 }
  0x18   :  { %p411_p8 = scmp.ne.s32.totalorder %s646_s0, %s410_s26  ;;  %p414_p9 = scmp.lt.u32.totalorder %s410_s26, %s646_s0 }
  0x1a   :  { %p416_p10 = pnand %p414_p9, %p411_p8 }
  0x1c   :  { %419 = shalt.err (!%p416_p10)
}
  0x1d   :  { %s420_s10 = scalar_lea.vmem %s27_s14, 128  ;;  %p425_p12 = scmp.lt.s32.totalorder %s27_s14, %s27_s14 }
  0x1e   :  { %p421_p11 = scmp.ne.s32.totalorder %s27_s14, %s420_s10  ;;  %p426_p13 = scmp.lt.s32.totalorder %s420_s10, %s420_s10 }
  0x20   :  { %p427_p0 = por %p426_p13, %p425_p12 }
  0x22   :  { %p428_p1 = pnand %p427_p0, %p421_p11 }
  0x24   :  { %431 = shalt.err (!%p428_p1)
}
  0x25   :  { %29 = dma.hbm_to_vmem [thread:$0]  %s646_s0, 128, %s27_s14, [#allocation4]  }
  0x26   :  { %s508_s12 = smov [#allocation8]   ;;  %s432_s17 = scalar_lea.hbm %s648_s2, 128 }
  0x27   :  { %s45_s13 = sshll.u32 %s508_s12, 4  ;;  %p433_p2 = scmp.ne.s32.totalorder %s648_s2, %s432_s17  ;;  %s46_s13 = int_to_ptr.vmem [resolvable:$true] %s45_s13 }
  0x28   :  { %p436_p3 = scmp.lt.u32.totalorder %s432_s17, %s648_s2 }
  0x2a   :  { %p438_p4 = pnand %p436_p3, %p433_p2 }
  0x2c   :  { %441 = shalt.err (!%p438_p4)
}
  0x2d   :  { %s442_s21 = scalar_lea.vmem %s46_s13, 128  ;;  %p447_p6 = scmp.lt.s32.totalorder %s46_s13, %s46_s13 }
  0x2e   :  { %p443_p5 = scmp.ne.s32.totalorder %s46_s13, %s442_s21  ;;  %p448_p7 = scmp.lt.s32.totalorder %s442_s21, %s442_s21 }
  0x30   :  { %p449_p8 = por %p448_p7, %p447_p6 }
  0x32   :  { %p450_p9 = pnand %p449_p8, %p443_p5 }
  0x34   :  { %453 = shalt.err (!%p450_p9)
}
  0x35   :  { %s509_s0 = smov 64   ;;  %s510_s14 = smov 4  }
  0x36   :  { %51 = dma.hbm_to_vmem [thread:$0]  %s648_s2, 128, %s46_s13, [#allocation7], %s509_s0, %s509_s0, %s510_s14  }
  0x37   :  { %s511_s24 = smov [#allocation9]   ;;  %s454_s28 = scalar_lea.hbm %s649_s3, 128 }
  0x38   :  { %s57_s25 = sshll.u32 %s511_s24, 4  ;;  %p455_p10 = scmp.ne.s32.totalorder %s649_s3, %s454_s28  ;;  %s58_s25 = int_to_ptr.vmem [resolvable:$true] %s57_s25 }
  0x39   :  { %p458_p11 = scmp.lt.u32.totalorder %s454_s28, %s649_s3 }
  0x3b   :  { %p460_p12 = pnand %p458_p11, %p455_p10 }
  0x3d   :  { %463 = shalt.err (!%p460_p12)
}
  0x3e   :  { %s464_s11 = scalar_lea.vmem %s58_s25, 128  ;;  %p469_p0 = scmp.lt.s32.totalorder %s58_s25, %s58_s25 }
  0x3f   :  { %p465_p13 = scmp.ne.s32.totalorder %s58_s25, %s464_s11  ;;  %p470_p1 = scmp.lt.s32.totalorder %s464_s11, %s464_s11 }
  0x41   :  { %p471_p2 = por %p470_p1, %p469_p0 }
  0x43   :  { %p472_p3 = pnand %p471_p2, %p465_p13 }
  0x45   :  { %475 = shalt.err (!%p472_p3)
}
  0x46   :  { %63 = dma.hbm_to_vmem [thread:$0]  %s649_s3, 128, %s58_s25, [#allocation10], %s509_s0, %s509_s0, %s510_s14  }
  0x47   :  { %498 = dma.done.wait [#allocation4], 128  }
  0x48   :  { %499 = vsyncadd [#allocation4], 4294967168 }
  0x49   :  { %500 = dma.done.wait [#allocation7], 256  }
  0x4a   :  { %501 = vsyncadd [#allocation7], 4294967040 }
  0x4b   :  { %502 = dma.done.wait [#allocation10], 128  }
  0x4c   :  { %503 = vsyncadd [#allocation10], 4294967168  ;;  %v512_v1 = vmov 0.0   ;;  %vm513_vm0 = vmmov 0   ;;  %v380_v2 = vld [vmem:[#allocation9] sm:$0xff]   ;;  %v381_v3 = vld [vmem:[#allocation8] sm:$0xff]   ;;  %v293_v37 = vlaneseq }
  0x4d   :  { %349 = vmatprep.subr.bf16.mxu0 %v512_v1  ;;  %355 = vmatprep.subr.bf16.mxu1 %v512_v1  ;;  %v91_v4 = vld [vmem:[#allocation6] sm:$0xff]  ;;  %vm101_vm1 = vcmask 130048   ;;  %v87_v5 = vld [vmem:[#allocation3] sm:$0xff]  ;;  %v335_v12 = vld [vmem:[%s650_s4] ss:$0 sm:$0xff]  ;;  %vm229_vm3 = vcmask 261120  }
  0x4e   :  { %351 = vmatprep.mubr.msk.bf16.mxu0 %vm513_vm0, %v512_v1  ;;  %357 = vmatprep.mubr.msk.bf16.mxu1 %vm513_vm0, %v512_v1  ;;  %v92_v6 = vpack.c.bf16 %v91_v4, %v91_v4  ;;  %v88_v7 = vpack.c.bf16 %v87_v5, %v87_v5  ;;  %v382_v8 = vld [vmem:[%s651_s5] sm:$0xff]   ;;  %v383_v9 = vld [vmem:[%s651_s5 + $0x8] sm:$0xff]   ;;  %v514_v24 = vmov 0   ;;  %v294_v38 = vshrl.u32 %v293_v37, 7 }
  0x4f   :  { %350 = vmatpush3.bf16.msra.mxu0 %v380_v2  ;;  %356 = vmatpush3.bf16.msra.mxu1 %v381_v3  ;;  %v336_v25 = vld [vmem:[%s652_s6] ss:$0 sm:$0xff]  ;;  %v306_v47 = vand.u32 127, %v293_v37  ;;  %s515_s6 = smov [#allocation11]   ;;  %vm312_vm5 = vcmask 57344  }
  0x50   :  { %361 = vmatprep.subr.bf16.mxu0 %v512_v1  ;;  %379 = vset.pattern.permute.xlu0 %v514_v24  ;;  %v340_v32 = vld [vmem:[%s653_s7] ss:$0 sm:$0xff]  ;;  %v295_v40 = vsub.s32 0, %v294_v38  ;;  %s320_s7 = sshll.u32 %s515_s6, 4  ;;  %s321_s7 = int_to_ptr.vmem [resolvable:$true] %s320_s7 }
  0x51   :  { %v287_v36 = vld [vmem:[#allocation2] sm:$0x1]  ;;  %v309_v48 = vsub.s32 %v306_v47, %v294_v38  ;;  %s476_s20 = scalar_lea.vmem %s321_s7, 16  ;;  %s480_s21 = scalar_lea.vmem %s321_s7, 32 }
  0x52   :  { %352 = vmatmul.mubr.msk.bf16.vlgmr.msra.gmra.mrb[0].mxu0 %vm101_vm1, %v92_v6  ;;  %358 = vmatmul.mubr.msk.bf16.vlgmr.msra.gmra.mrb[0].mxu1 %vm101_vm1, %v88_v7  ;;  %p477_p4 = scmp.ne.s32.totalorder %s321_s7, %s476_s20  ;;  %p481_p5 = scmp.lt.s32.totalorder %s321_s7, %s321_s7 }
  0x53   :  { %365 = vmatprep.mubr.msk.bf16.mxu0 %vm513_vm0, %v512_v1  ;;  %362 = vmatpush3.bf16.msra.mxu0 %v382_v8  ;;  %p482_p6 = scmp.lt.s32.totalorder %s480_s21, %s476_s20 }
  0x54   :  { %363 = vmatprep.subr.bf16.mxu0 %v512_v1 }
  0x55   :  { %p483_p7 = por %p482_p6, %p481_p5 }
  0x57   :  { %364 = vmatpush3.bf16.msra.mxu0 %v383_v9  ;;  %p484_p8 = pnand %p483_p7, %p477_p4 }
 0x125   :  { %v139_v10 = vpop.f32.mrb[0].mxu0  ;;  %v188_v11 = vpop.f32.mrb[0].mxu1 }
 0x126   :  { %v353_v13 = vpop.f32.mrb[1].mxu0  ;;  %v189_v14 = vadd.f32 %v188_v11, %v139_v10  ;;  %v359_v15 = vpop.f32.mrb[1].mxu1 }
 0x127   :  { %v142_v16 = vpop.f32.mrb[2].mxu0  ;;  %v191_v17 = vpop.f32.mrb[2].mxu1 }
 0x128   :  { %v354_v18 = vpop.f32.mrb[3].mxu0  ;;  %v201_v19 = vadd.f32 %v335_v12, %v189_v14  ;;  %v360_v20 = vpop.f32.mrb[3].mxu1 }
 0x12a   :  { %vm202_vm2 = vcmp.gt.f32.partialorder %v201_v19, 0.0  ;;  %v203_v21 = vmul.f32 0.01, %v201_v19 }
 0x12c   :  { %v204_v22 = vsel %vm202_vm2, %v201_v19, %v203_v21 }
 0x12d   :  { %v205_v23 = vpack.c.bf16 %v204_v22, %v204_v22 }
 0x12f   :  { %366 = vmatmul.mubr.msk.bf16.vlgmr.msra.gmra.mrb[4].mxu0 %vm229_vm3, %v205_v23 }
 0x202   :  { %v267_v26 = vpop.f32.mrb[4].mxu0 }
 0x203   :  { %v268_v27 = vadd.f32 %v336_v25, %v267_v26  ;;  %v367_v28 = vpop.f32.mrb[5].mxu0 }
 0x204   :  { %v270_v29 = vpop.f32.mrb[6].mxu0 }
 0x205   :  { %v274_v30 = vmul.f32 0.01, %v268_v27  ;;  %v368_v31 = vpop.f32.mrb[7].mxu0  ;;  %vm273_vm4 = vcmp.gt.f32.partialorder %v268_v27, 0.0 }
 0x207   :  { %v275_v33 = vsel %vm273_vm4, %v268_v27, %v274_v30 }
 0x208   :  { %v283_v34 = vmul.f32 %v340_v32, %v275_v33 }
 0x20a   :  { %v284_v35 = vsel %vm229_vm3, %v283_v34, 0.0 }
 0x20b   :  { %285 = vadd.xlane.f32.xlu0 %v284_v35 }
 0x221   :  { %290 = vperm.xlu0 %379, %v287_v36  }
 0x298   :  { %v286_v39 = vpop.xlane.xlu0 %285 }
 0x2a0   :  { %v291_v41 = vpop.permute.xlu0 %290 }
 0x2a1   :  { %v296_v42 = vrot.slane %v291_v41, %v295_v40 }
 0x2a3   :  { %v297_v43 = vadd.f32 %v296_v42, %v286_v39 }
 0x2a5   :  { %v341_v44 = vmul.f32 -1.442695, %v297_v43 }
 0x2a7   :  { %384 = vpow2.f32 %v341_v44 }
 0x2b1   :  { %v385_v45 = vpop.eup %384 }
 0x2b2   :  { %v301_v46 = vadd.f32 1.0, %v385_v45 }
 0x2b4   :  { %386 = vrcp.f32 %v301_v46 }
 0x2be   :  { %v387_v49 = vpop.eup %386 }
 0x2bf   :  { %v310_v50 = vrot.slane %v387_v49, %v309_v48 }
 0x2c1   :  { %313 = vst.msk [vmem:[#allocation11] sm:$0x1] %vm312_vm5, %v310_v50 }
 0x2c2   :  { %487 = shalt.err (!%p484_p8)
}
 0x2c3   :  { %s488_s22 = scalar_lea.hbm %s655_s9, 16 }
 0x2c4   :  { %p489_p9 = scmp.ne.s32.totalorder %s655_s9, %s488_s22  ;;  %p492_p10 = scmp.lt.u32.totalorder %s488_s22, %s655_s9 }
 0x2c6   :  { %p494_p11 = pnand %p492_p10, %p489_p9 }
 0x2c8   :  { %497 = shalt.err (!%p494_p11)
}
 0x2c9   :  { %323 = dma.vmem_to_hbm [thread:$0]  %s321_s7, 16, %s655_s9, [#allocation5]  }
 0x2ca   :  { %504 = dma.done.wait [#allocation5], 16  }
 0x2cb   :  { %505 = vsyncadd [#allocation5], 4294967280 }
 0x2cc   :  { %327 = vsyncpa [#allocation4], 1 }
 0x2cd   :  { %328 = vsyncpa [#allocation7], 1 }
 0x2ce   :  { %329 = vsyncpa [#allocation10], 1 }
 0x2cf   :  { %330 = vsyncpa [#allocation5], 1 }

</bundles_post_ra>
